<compile_context>
chip_gen: v6e
topology: v6e:2x2x1
jax: 0.10.0
libtpu: 0.0.40
codegen_flags: <defaults>
</compile_context>

<pallas_src>
import functools

import jax
import jax.numpy as jnp
from jax.experimental import pallas as pl
from jax.experimental.pallas import tpu as pltpu


def _round_up(v, m):
    return (v + m - 1) // m * m


# --------------------------------------------------------------------------
# Fused two-layer GCN kernel
# --------------------------------------------------------------------------
def _fused_gcn_kernel(a_ref, x_ref, w1_ref, b1_ref, w2_ref, b2_ref, o_ref,
                      xw_ref, h_ref, hw2_ref, *, tm):
    phase = pl.program_id(0)     # 0 = layer 1, 1 = layer 2
    i = pl.program_id(1)         # row tile of A_hat
    row0 = pl.multiple_of(i * tm, tm)

    @pl.when(phase == 0)
    def _layer1():
        @pl.when(i == 0)
        def _():
            # X @ W1 for all nodes, computed once, kept resident in VMEM (bf16).
            xw_ref[...] = jnp.dot(
                x_ref[...], w1_ref[...], preferred_element_type=jnp.float32
            ).astype(xw_ref.dtype)

        h = jnp.dot(a_ref[...], xw_ref[...],
                    preferred_element_type=jnp.float32) + b1_ref[...]
        h_ref[pl.ds(row0, tm), :] = jnp.maximum(h, 0.0).astype(h_ref.dtype)
        # The real output block is produced in phase 1; write zeros here so the
        # (later overwritten) phase-0 writeback is well defined.
        o_ref[...] = jnp.zeros_like(o_ref)

    @pl.when(phase == 1)
    def _layer2():
        @pl.when(i == 0)
        def _():
            # H @ W2 for all nodes, computed once.
            hw2_ref[...] = jnp.dot(
                h_ref[...], w2_ref[...], preferred_element_type=jnp.float32
            ).astype(hw2_ref.dtype)

        out = jnp.dot(a_ref[...], hw2_ref[...],
                      preferred_element_type=jnp.float32) + b2_ref[...]
        o_ref[...] = out.astype(o_ref.dtype)


def fused_gcn_forward_pallas(a_hat, x, w1, b1, w2, b2):
    """out = A_hat @ relu(A_hat @ X @ W1 + b1) @ W2 + b2, in one pallas_call."""
    n, f_in = x.shape
    hid = w1.shape[1]
    f_out = w2.shape[1]

    LANE = 128
    n_pad = _round_up(n, LANE)
    fi_p = _round_up(f_in, LANE)
    fh_p = _round_up(hid, LANE)
    fo_p = _round_up(f_out, LANE)

    # Row tile of A_hat: 256 keeps double-buffered A tiles comfortably inside
    # v7x's 64 MiB VMEM at large N; tiny graphs use a single 128-row tile.
    tm = 256 if n_pad % 256 == 0 else 128
    n_tiles = n_pad // tm

    bf16 = jnp.bfloat16
    a_p = jnp.pad(a_hat, ((0, n_pad - n), (0, n_pad - n))).astype(bf16)
    x_p = jnp.pad(x, ((0, n_pad - n), (0, fi_p - f_in))).astype(bf16)
    w1_p = jnp.pad(w1, ((0, fi_p - f_in), (0, fh_p - hid))).astype(bf16)
    w2_p = jnp.pad(w2, ((0, fh_p - hid), (0, fo_p - f_out))).astype(bf16)
    b1_p = jnp.pad(b1, (0, fh_p - hid)).reshape(1, fh_p).astype(jnp.float32)
    b2_p = jnp.pad(b2, (0, fo_p - f_out)).reshape(1, fo_p).astype(jnp.float32)

    kernel = functools.partial(_fused_gcn_kernel, tm=tm)
    out_p = pl.pallas_call(
        kernel,
        out_shape=jax.ShapeDtypeStruct((n_pad, fo_p), jnp.float32),
        grid_spec=pltpu.PrefetchScalarGridSpec(
            num_scalar_prefetch=0,
            grid=(2, n_tiles),                                      # (phase, row tile)
            in_specs=[
                pl.BlockSpec((tm, n_pad), lambda p, i: (i, 0)),     # A_hat row tile
                pl.BlockSpec((n_pad, fi_p), lambda p, i: (0, 0)),   # X   (resident)
                pl.BlockSpec((fi_p, fh_p), lambda p, i: (0, 0)),    # W1  (resident)
                pl.BlockSpec((1, fh_p), lambda p, i: (0, 0)),       # b1  (resident)
                pl.BlockSpec((fh_p, fo_p), lambda p, i: (0, 0)),    # W2  (resident)
                pl.BlockSpec((1, fo_p), lambda p, i: (0, 0)),       # b2  (resident)
            ],
            out_specs=pl.BlockSpec((tm, fo_p), lambda p, i: (i, 0)),
            scratch_shapes=[
                pltpu.VMEM((n_pad, fh_p), bf16),   # X @ W1
                pltpu.VMEM((n_pad, fh_p), bf16),   # H = relu(A @ XW1 + b1)
                pltpu.VMEM((n_pad, fo_p), bf16),   # H @ W2
            ],
        ),
        compiler_params=pltpu.CompilerParams(
            # Phase 1 consumes the per-core H scratch filled across ALL phase-0
            # row tiles, so neither grid axis may be sharded across cores.
            dimension_semantics=("arbitrary", "arbitrary"),
        ),
    )(a_p, x_p, w1_p, b1_p, w2_p, b2_p)
    return out_p[:n, :f_out]


# --------------------------------------------------------------------------
# Glue: normalized adjacency from edge_index (PyG GCNConv semantics)
# --------------------------------------------------------------------------
def build_normalized_adjacency(edge_index, num_nodes):
    """A_hat = D^{-1/2} (A + I_missing) D^{-1/2}; duplicate edges accumulate."""
    src = edge_index[0]
    dst = edge_index[1]
    a = jnp.zeros((num_nodes, num_nodes), jnp.float32).at[dst, src].add(1.0)
    # add_remaining_self_loops: only nodes without an existing self-loop get one.
    diag = jnp.diagonal(a)
    a = a + jnp.diag(jnp.where(diag == 0.0, 1.0, 0.0))
    deg = a.sum(axis=1)
    d_inv_sqrt = jnp.where(deg > 0, jax.lax.rsqrt(deg), 0.0)
    return d_inv_sqrt[:, None] * a * d_inv_sqrt[None, :]


# --------------------------------------------------------------------------
# FraudGCN forward
# --------------------------------------------------------------------------
@jax.jit
def fraud_gcn_forward(x, edge_index, params):
    a_hat = build_normalized_adjacency(edge_index, x.shape[0])
    return fused_gcn_forward_pallas(a_hat, x, params["w1"], params["b1"],
                                    params["w2"], params["b2"])


def init_params(key, input_dim, hidden_dim, output_dim):
    k1, k2 = jax.random.split(key)
    # Glorot-style init (GCNConv default: glorot weight, zero bias).
    w1 = jax.random.normal(k1, (input_dim, hidden_dim), jnp.float32) * (
        (2.0 / (input_dim + hidden_dim)) ** 0.5
    )
    w2 = jax.random.normal(k2, (hidden_dim, output_dim), jnp.float32) * (
        (2.0 / (hidden_dim + output_dim)) ** 0.5
    )
    b1 = jnp.zeros((hidden_dim,), jnp.float32)
    b2 = jnp.zeros((output_dim,), jnp.float32)
    return {"w1": w1, "b1": b1, "w2": w2, "b2": b2}


# --------------------------------------------------------------------------
if __name__ == "__main__":
    NUM_NODES = 64
    INPUT_DIM = 16
    HIDDEN_DIM = 32
    OUTPUT_DIM = 8
    NUM_EDGES = 128

    key = jax.random.PRNGKey(0)
    k_x, k_e, k_p = jax.random.split(key, 3)

    # node features
    x = jax.random.normal(k_x, (NUM_NODES, INPUT_DIM), jnp.float32)

    # random undirected graph: sample directed edges, then symmetrize
    e = jax.random.randint(k_e, (2, NUM_EDGES), 0, NUM_NODES, dtype=jnp.int32)
    edge_index = jnp.concatenate([e, e[::-1]], axis=1)  # (2, 2*NUM_EDGES)

    params = init_params(k_p, INPUT_DIM, HIDDEN_DIM, OUTPUT_DIM)

    out = jax.block_until_ready(fraud_gcn_forward(x, edge_index, params))
    assert out.shape == (NUM_NODES, OUTPUT_DIM)

    # ---- correctness checks ------------------------------------------------
    a_hat = build_normalized_adjacency(edge_index, NUM_NODES)
    bf16 = jnp.bfloat16

    # Reference matching the kernel's numerics (bf16 MXU operands, f32 accum).
    xw = jnp.dot(x.astype(bf16), params["w1"].astype(bf16),
                 preferred_element_type=jnp.float32).astype(bf16)
    h = jnp.maximum(
        jnp.dot(a_hat.astype(bf16), xw, preferred_element_type=jnp.float32)
        + params["b1"], 0.0).astype(bf16)
    hw2 = jnp.dot(h, params["w2"].astype(bf16),
                  preferred_element_type=jnp.float32).astype(bf16)
    ref_bf16 = jnp.dot(a_hat.astype(bf16), hw2,
                       preferred_element_type=jnp.float32) + params["b2"]
    assert jnp.allclose(out, ref_bf16, atol=2e-3, rtol=2e-3)

    # Loose check against full-f32 math (difference is bf16 operand rounding).
    ref_h = jnp.maximum(a_hat @ (x @ params["w1"]) + params["b1"], 0.0)
    ref_f32 = a_hat @ (ref_h @ params["w2"]) + params["b2"]
    assert jnp.allclose(out, ref_f32, atol=1e-1, rtol=1e-1)

    print("KERNEL_OK")
</pallas_src>

<mosaic_0001>
module attributes {stable_mosaic.version = 11 : i64} {
  func.func private @main(%arg0: i32) attributes {dimension_semantics = [#tpu.dimension_semantics<core_parallel>], iteration_bounds = array<i64: 2>, tpu.core_type = #tpu.core_type<sc_scalar_subcore>, window_params = []} {
    return
  }
}

module attributes {stable_mosaic.version = 11 : i64} {
  func.func private @main(%arg0: i32) attributes {dimension_semantics = [#tpu.dimension_semantics<core_parallel>], iteration_bounds = array<i64: 2>, tpu.core_type = #tpu.core_type<sc_scalar_subcore>, window_params = []} {
    return
  }
}

module attributes {stable_mosaic.version = 11 : i64} {
  func.func @_fused_gcn_kernel(%arg0: i32, %arg1: i32, %arg2: memref<128x128xbf16, #tpu.memory_space<vmem>>, %arg3: memref<128x128xbf16, #tpu.memory_space<vmem>>, %arg4: memref<128x128xbf16, #tpu.memory_space<vmem>>, %arg5: memref<1x128xf32, #tpu.memory_space<vmem>>, %arg6: memref<128x128xbf16, #tpu.memory_space<vmem>>, %arg7: memref<1x128xf32, #tpu.memory_space<vmem>>, %arg8: memref<128x128xf32, #tpu.memory_space<vmem>>, %arg9: memref<128x128xbf16, #tpu.memory_space<vmem>>, %arg10: memref<128x128xbf16, #tpu.memory_space<vmem>>, %arg11: memref<128x128xbf16, #tpu.memory_space<vmem>>) attributes {dimension_semantics = [#tpu.dimension_semantics<arbitrary>, #tpu.dimension_semantics<arbitrary>], iteration_bounds = array<i64: 2, 1>, scalar_prefetch = 0 : i64, scratch_operands = 3 : i64, tpu.core_type = #tpu.core_type<tc>, window_params = [{transform_indices = @transform_0, window_bounds = array<i64: 128, 128>}, {pipeline_mode = #tpu.pipeline_mode<synchronous>, transform_indices = @transform_1, window_bounds = array<i64: 128, 128>}, {pipeline_mode = #tpu.pipeline_mode<synchronous>, transform_indices = @transform_2, window_bounds = array<i64: 128, 128>}, {pipeline_mode = #tpu.pipeline_mode<synchronous>, transform_indices = @transform_3, window_bounds = array<i64: 1, 128>}, {pipeline_mode = #tpu.pipeline_mode<synchronous>, transform_indices = @transform_4, window_bounds = array<i64: 128, 128>}, {pipeline_mode = #tpu.pipeline_mode<synchronous>, transform_indices = @transform_5, window_bounds = array<i64: 1, 128>}, {transform_indices = @transform_6, window_bounds = array<i64: 128, 128>}]} {
    %c128_i32 = arith.constant 128 : i32
    %0 = arith.muli %arg1, %c128_i32 : i32
    %1 = tpu.assume_multiple %0, 128 : i32
    %c0_i32 = arith.constant 0 : i32
    %2 = arith.cmpi eq, %arg0, %c0_i32 : i32
    %3 = arith.extui %2 : i1 to i32
    %c0_i32_0 = arith.constant 0 : i32
    %4 = arith.cmpi ne, %3, %c0_i32_0 : i32
    scf.if %4 {
      %c0_i32_2 = arith.constant 0 : i32
      %8 = arith.cmpi eq, %arg1, %c0_i32_2 : i32
      %9 = arith.extui %8 : i1 to i32
      %c0_i32_3 = arith.constant 0 : i32
      %10 = arith.cmpi ne, %9, %c0_i32_3 : i32
      scf.if %10 {
        %c0_14 = arith.constant 0 : index
        %c0_15 = arith.constant 0 : index
        %24 = vector.load %arg3[%c0_14, %c0_15] : memref<128x128xbf16, #tpu.memory_space<vmem>>, vector<128x128xbf16>
        %c0_16 = arith.constant 0 : index
        %c0_17 = arith.constant 0 : index
        %25 = vector.load %arg4[%c0_16, %c0_17] : memref<128x128xbf16, #tpu.memory_space<vmem>>, vector<128x128xbf16>
        %cst_18 = arith.constant dense<0.000000e+00> : vector<128x128xf32>
        %26 = tpu.matmul %24, %25, %cst_18 {dimension_numbers = #tpu.dot_dimension_numbers<[1], [0], [0], [1], [0, 0, 1, 1], [], []>} : vector<128x128xbf16>, vector<128x128xbf16>, vector<128x128xf32> -> vector<128x128xf32>
        %27 = arith.truncf %26 : vector<128x128xf32> to vector<128x128xbf16>
        %c0_19 = arith.constant 0 : index
        %c0_20 = arith.constant 0 : index
        %28 = vector.load %arg9[%c0_19, %c0_20] : memref<128x128xbf16, #tpu.memory_space<vmem>>, vector<128x128xbf16>
        tpu.vector_store %arg9[%c0_19, %c0_20], %27 {strides = array<i32>} : memref<128x128xbf16, #tpu.memory_space<vmem>>, vector<128x128xbf16>,
      } else {
      }
      %c0 = arith.constant 0 : index
      %c0_4 = arith.constant 0 : index
      %11 = vector.load %arg2[%c0, %c0_4] : memref<128x128xbf16, #tpu.memory_space<vmem>>, vector<128x128xbf16>
      %c0_5 = arith.constant 0 : index
      %c0_6 = arith.constant 0 : index
      %12 = vector.load %arg9[%c0_5, %c0_6] : memref<128x128xbf16, #tpu.memory_space<vmem>>, vector<128x128xbf16>
      %cst = arith.constant dense<0.000000e+00> : vector<128x128xf32>
      %13 = tpu.matmul %11, %12, %cst {dimension_numbers = #tpu.dot_dimension_numbers<[1], [0], [0], [1], [0, 0, 1, 1], [], []>} : vector<128x128xbf16>, vector<128x128xbf16>, vector<128x128xf32> -> vector<128x128xf32>
      %c0_7 = arith.constant 0 : index
      %c0_8 = arith.constant 0 : index
      %14 = vector.load %arg5[%c0_7, %c0_8] : memref<1x128xf32, #tpu.memory_space<vmem>>, vector<1x128xf32>
      %15 = vector.broadcast %14 : vector<1x128xf32> to vector<128x128xf32>
      %16 = arith.addf %13, %15 : vector<128x128xf32>
      %cst_9 = arith.constant 0.000000e+00 : f32
      %17 = vector.broadcast %cst_9 : f32 to vector<128x128xf32>
      %18 = arith.maximumf %16, %17 : vector<128x128xf32>
      %19 = arith.truncf %18 : vector<128x128xf32> to vector<128x128xbf16>
      %20 = arith.index_cast %1 : i32 to index
      %c0_10 = arith.constant 0 : index
      %21 = vector.load %arg10[%20, %c0_10] : memref<128x128xbf16, #tpu.memory_space<vmem>>, vector<128x128xbf16>
      tpu.vector_store %arg10[%20, %c0_10], %19 {strides = array<i32>} : memref<128x128xbf16, #tpu.memory_space<vmem>>, vector<128x128xbf16>,
      %cst_11 = arith.constant 0.000000e+00 : f32
      %22 = vector.broadcast %cst_11 : f32 to vector<128x128xf32>
      %c0_12 = arith.constant 0 : index
      %c0_13 = arith.constant 0 : index
      %23 = vector.load %arg8[%c0_12, %c0_13] : memref<128x128xf32, #tpu.memory_space<vmem>>, vector<128x128xf32>
      tpu.vector_store %arg8[%c0_12, %c0_13], %22 {strides = array<i32>} : memref<128x128xf32, #tpu.memory_space<vmem>>, vector<128x128xf32>,
    } else {
    }
    %c1_i32 = arith.constant 1 : i32
    %5 = arith.cmpi eq, %arg0, %c1_i32 : i32
    %6 = arith.extui %5 : i1 to i32
    %c0_i32_1 = arith.constant 0 : i32
    %7 = arith.cmpi ne, %6, %c0_i32_1 : i32
    scf.if %7 {
      %c0_i32_2 = arith.constant 0 : i32
      %8 = arith.cmpi eq, %arg1, %c0_i32_2 : i32
      %9 = arith.extui %8 : i1 to i32
      %c0_i32_3 = arith.constant 0 : i32
      %10 = arith.cmpi ne, %9, %c0_i32_3 : i32
      scf.if %10 {
        %c0_11 = arith.constant 0 : index
        %c0_12 = arith.constant 0 : index
        %18 = vector.load %arg10[%c0_11, %c0_12] : memref<128x128xbf16, #tpu.memory_space<vmem>>, vector<128x128xbf16>
        %c0_13 = arith.constant 0 : index
        %c0_14 = arith.constant 0 : index
        %19 = vector.load %arg6[%c0_13, %c0_14] : memref<128x128xbf16, #tpu.memory_space<vmem>>, vector<128x128xbf16>
        %cst_15 = arith.constant dense<0.000000e+00> : vector<128x128xf32>
        %20 = tpu.matmul %18, %19, %cst_15 {dimension_numbers = #tpu.dot_dimension_numbers<[1], [0], [0], [1], [0, 0, 1, 1], [], []>} : vector<128x128xbf16>, vector<128x128xbf16>, vector<128x128xf32> -> vector<128x128xf32>
        %21 = arith.truncf %20 : vector<128x128xf32> to vector<128x128xbf16>
        %c0_16 = arith.constant 0 : index
        %c0_17 = arith.constant 0 : index
        %22 = vector.load %arg11[%c0_16, %c0_17] : memref<128x128xbf16, #tpu.memory_space<vmem>>, vector<128x128xbf16>
        tpu.vector_store %arg11[%c0_16, %c0_17], %21 {strides = array<i32>} : memref<128x128xbf16, #tpu.memory_space<vmem>>, vector<128x128xbf16>,
      } else {
      }
      %c0 = arith.constant 0 : index
      %c0_4 = arith.constant 0 : index
      %11 = vector.load %arg2[%c0, %c0_4] : memref<128x128xbf16, #tpu.memory_space<vmem>>, vector<128x128xbf16>
      %c0_5 = arith.constant 0 : index
      %c0_6 = arith.constant 0 : index
      %12 = vector.load %arg11[%c0_5, %c0_6] : memref<128x128xbf16, #tpu.memory_space<vmem>>, vector<128x128xbf16>
      %cst = arith.constant dense<0.000000e+00> : vector<128x128xf32>
      %13 = tpu.matmul %11, %12, %cst {dimension_numbers = #tpu.dot_dimension_numbers<[1], [0], [0], [1], [0, 0, 1, 1], [], []>} : vector<128x128xbf16>, vector<128x128xbf16>, vector<128x128xf32> -> vector<128x128xf32>
      %c0_7 = arith.constant 0 : index
      %c0_8 = arith.constant 0 : index
      %14 = vector.load %arg7[%c0_7, %c0_8] : memref<1x128xf32, #tpu.memory_space<vmem>>, vector<1x128xf32>
      %15 = vector.broadcast %14 : vector<1x128xf32> to vector<128x128xf32>
      %16 = arith.addf %13, %15 : vector<128x128xf32>
      %c0_9 = arith.constant 0 : index
      %c0_10 = arith.constant 0 : index
      %17 = vector.load %arg8[%c0_9, %c0_10] : memref<128x128xf32, #tpu.memory_space<vmem>>, vector<128x128xf32>
      tpu.vector_store %arg8[%c0_9, %c0_10], %16 {strides = array<i32>} : memref<128x128xf32, #tpu.memory_space<vmem>>, vector<128x128xf32>,
    } else {
    }
    return
  }
  func.func @transform_0(%arg0: i32, %arg1: i32) -> (i32, i32) {
    %c0_i32 = arith.constant 0 : i32
    %c0_i32_0 = arith.constant 0 : i32
    return %arg1, %c0_i32 : i32, i32
  }
  func.func @transform_1(%arg0: i32, %arg1: i32) -> (i32, i32) {
    %c0_i32 = arith.constant 0 : i32
    %c0_i32_0 = arith.constant 0 : i32
    %c0_i32_1 = arith.constant 0 : i32
    return %c0_i32, %c0_i32_0 : i32, i32
  }
  func.func @transform_2(%arg0: i32, %arg1: i32) -> (i32, i32) {
    %c0_i32 = arith.constant 0 : i32
    %c0_i32_0 = arith.constant 0 : i32
    %c0_i32_1 = arith.constant 0 : i32
    return %c0_i32, %c0_i32_0 : i32, i32
  }
  func.func @transform_3(%arg0: i32, %arg1: i32) -> (i32, i32) {
    %c0_i32 = arith.constant 0 : i32
    %c0_i32_0 = arith.constant 0 : i32
    %c0_i32_1 = arith.constant 0 : i32
    return %c0_i32, %c0_i32_0 : i32, i32
  }
  func.func @transform_4(%arg0: i32, %arg1: i32) -> (i32, i32) {
    %c0_i32 = arith.constant 0 : i32
    %c0_i32_0 = arith.constant 0 : i32
    %c0_i32_1 = arith.constant 0 : i32
    return %c0_i32, %c0_i32_0 : i32, i32
  }
  func.func @transform_5(%arg0: i32, %arg1: i32) -> (i32, i32) {
    %c0_i32 = arith.constant 0 : i32
    %c0_i32_0 = arith.constant 0 : i32
    %c0_i32_1 = arith.constant 0 : i32
    return %c0_i32, %c0_i32_0 : i32, i32
  }
  func.func @transform_6(%arg0: i32, %arg1: i32) -> (i32, i32) {
    %c0_i32 = arith.constant 0 : i32
    %c0_i32_0 = arith.constant 0 : i32
    return %arg1, %c0_i32 : i32, i32
  }
}

</mosaic_0001>

<bundles_post_ra>
// kernel: fraud_gcn_forward.1
= control target key start
LH: loop header
LB: loop body
LE: loop exit
PB: predicated region body
PF: predicated region fallthrough
CT: control target
= control target key end

     0   :  { %s2212_s21 = smov 0   ;;  %s2214_s22 = smov 0   ;;  %s2465_s0 = inlined_call_operand.vmem [shape: bf16[128,128], index: 0, kind: input, shape index: {}]   ;;  %s2466_s1 = inlined_call_operand.vmem [shape: bf16[128,128], index: 1, kind: input, shape index: {}]   ;;  %s2467_s2 = inlined_call_operand.vmem [shape: bf16[128,128], index: 2, kind: input, shape index: {}]   ;;  %s2468_s3 = inlined_call_operand.vmem [shape: f32[1,128], index: 3, kind: input, shape index: {}]   ;;  %s2469_s4 = inlined_call_operand.vmem [shape: bf16[128,128], index: 4, kind: input, shape index: {}]   ;;  %s2470_s5 = inlined_call_operand.vmem [shape: f32[1,128], index: 5, kind: input, shape index: {}]   ;;  %s2471_s6 = inlined_call_operand.vmem [shape: f32[128,128], index: 6, kind: output, shape index: {}]  }
   0x1   :  { %s2216_s23 = smov 0  }
   0x2 LB: > { %s28_s24 = sadd.s32 1, %s2170_s22  ;;  %p1561_p0 = scmp.ge.s32.totalorder %s2174_s23, 1  ;;  %s2174_s23 = sphi %s2216_s23, %s16_s23   ;;  %s2170_s22 = sphi %s2214_s22, %s2473_s22   ;;  %s2166_s21 = sphi %s2212_s21, %s2472_s21  }
   0x3   : > { %p30_p1 = scmp.ge.s32.totalorder %s28_s24, 2  ;;  %p225_p2 = scmp.lt.s32.totalorder %s2174_s23, 3 }
   0x5   : > { %s2475_s24 = smov (%p30_p1, %s28_s24), 0  ;;  %p226_p3 = pnand %p1561_p0, %p225_p2 }
   0x6   : > { %p1562_p4 = scmp.ne.s32.totalorder (!%p226_p3), %s2166_s21, 0 }
   0x7   : > { %229 = sbr.rel (%p226_p3) target bundleno = 1072 (0x430), region = 44 }
   0xc   : > { %272 = sbr.rel (%p1562_p4) target bundleno = 543 (0x21f), region = 48 }
  0x11   : > { %v2088_v0 = vld [vmem:[%s2467_s2 + $0x38] sm:$0xff]   ;;  %v2089_v1 = vld [vmem:[%s2467_s2 + $0x30] sm:$0xff]   ;;  %v2090_v2 = vld [vmem:[%s2467_s2 + $0x28] sm:$0xff]   ;;  %v2176_v56 = vmov 0.0  }
  0x12   : > { %1935 = vmatprep.subr.bf16.mxu0 %v2088_v0  ;;  %v2091_v3 = vld [vmem:[%s2467_s2 + $0x20] sm:$0xff]   ;;  %v2092_v5 = vld [vmem:[%s2467_s2 + $0x18] sm:$0xff]   ;;  %v2093_v6 = vld [vmem:[%s2467_s2 + $0x10] sm:$0xff]   ;;  %914 = vst [vmem:[%s2471_s6] sm:$0xff] %v2176_v56 }
  0x13   : > { %1936 = vmatpush3.bf16.msra.mxu0 %v2088_v0  ;;  %v2096_v4 = vld [vmem:[%s2466_s1] sm:$0xff]   ;;  %v2094_v7 = vld [vmem:[%s2467_s2 + $0x8] sm:$0xff]   ;;  %v2098_v10 = vld [vmem:[%s2466_s1 + $0x10] sm:$0xff]   ;;  %915 = vst [vmem:[%s2471_s6 + $0x8] sm:$0xff] %v2176_v56 }
  0x14   : > { %1937 = vmatprep.subr.bf16.mxu0 %v2089_v1  ;;  %1951 = vmatprep.mubr.bf16.mxu0 %v2096_v4  ;;  %v2095_v8 = vld [vmem:[%s2467_s2] sm:$0xff]   ;;  %v2097_v9 = vld [vmem:[%s2466_s1 + $0x8] sm:$0xff]   ;;  %v2099_v11 = vld [vmem:[%s2466_s1 + $0x18] sm:$0xff]   ;;  %916 = vst [vmem:[%s2471_s6 + $0x10] sm:$0xff] %v2176_v56 }
  0x15   : > { %v2100_v12 = vld [vmem:[%s2466_s1 + $0x20] sm:$0xff]   ;;  %v2101_v13 = vld [vmem:[%s2466_s1 + $0x28] sm:$0xff]   ;;  %v2102_v14 = vld [vmem:[%s2466_s1 + $0x30] sm:$0xff]   ;;  %917 = vst [vmem:[%s2471_s6 + $0x18] sm:$0xff] %v2176_v56 }
  0x16   : > { %v2103_v15 = vld [vmem:[%s2466_s1 + $0x38] sm:$0xff]   ;;  %v2112_v16 = vld [vmem:[%s2465_s0] sm:$0xff]   ;;  %v2113_v49 = vld [vmem:[%s2465_s0 + $0x8] sm:$0xff]   ;;  %918 = vst [vmem:[%s2471_s6 + $0x20] sm:$0xff] %v2176_v56 }
  0x17   : > { %1938 = vmatpush3.bf16.msra.mxu0 %v2089_v1  ;;  %1983 = vmatprep.mubr.bf16.mxu1 %v2112_v16  ;;  %v2114_v50 = vld [vmem:[%s2465_s0 + $0x10] sm:$0xff]   ;;  %v2115_v51 = vld [vmem:[%s2465_s0 + $0x18] sm:$0xff]   ;;  %v2116_v52 = vld [vmem:[%s2465_s0 + $0x20] sm:$0xff]   ;;  %919 = vst [vmem:[%s2471_s6 + $0x28] sm:$0xff] %v2176_v56 }
  0x18   : > { %1939 = vmatprep.subr.bf16.mxu0 %v2090_v2  ;;  %v2117_v53 = vld [vmem:[%s2465_s0 + $0x28] sm:$0xff]   ;;  %v2118_v54 = vld [vmem:[%s2465_s0 + $0x30] sm:$0xff]   ;;  %v2119_v55 = vld [vmem:[%s2465_s0 + $0x38] sm:$0xff]   ;;  %920 = vst [vmem:[%s2471_s6 + $0x30] sm:$0xff] %v2176_v56 }
  0x19   : > { %921 = vst [vmem:[%s2471_s6 + $0x38] sm:$0xff] %v2176_v56  ;;  %922 = vst [vmem:[%s2471_s6 + $0x40] sm:$0xff] %v2176_v56  ;;  %v1595_v58 = vld [vmem:[%s2468_s3] ss:$0 sm:$0xff] }
  0x1a   : > { %923 = vst [vmem:[%s2471_s6 + $0x48] sm:$0xff] %v2176_v56  ;;  %924 = vst [vmem:[%s2471_s6 + $0x50] sm:$0xff] %v2176_v56 }
  0x1b   : > { %1940 = vmatpush3.bf16.msra.mxu0 %v2090_v2  ;;  %925 = vst [vmem:[%s2471_s6 + $0x58] sm:$0xff] %v2176_v56  ;;  %926 = vst [vmem:[%s2471_s6 + $0x60] sm:$0xff] %v2176_v56 }
  0x1c   : > { %1941 = vmatprep.subr.bf16.mxu0 %v2091_v3  ;;  %927 = vst [vmem:[%s2471_s6 + $0x68] sm:$0xff] %v2176_v56  ;;  %928 = vst [vmem:[%s2471_s6 + $0x70] sm:$0xff] %v2176_v56 }
  0x1d   : > { %929 = vst [vmem:[%s2471_s6 + $0x78] sm:$0xff] %v2176_v56 }
  0x1f   : > { %1942 = vmatpush3.bf16.msra.mxu0 %v2091_v3 }
  0x20   : > { %1943 = vmatprep.subr.bf16.mxu0 %v2092_v5 }
  0x23   : > { %1944 = vmatpush3.bf16.msra.mxu0 %v2092_v5 }
  0x24   : > { %1945 = vmatprep.subr.bf16.mxu0 %v2093_v6 }
  0x27   : > { %1946 = vmatpush3.bf16.msra.mxu0 %v2093_v6 }
  0x28   : > { %1947 = vmatprep.subr.bf16.mxu0 %v2094_v7 }
  0x2b   : > { %1948 = vmatpush3.bf16.msra.mxu0 %v2094_v7 }
  0x2c   : > { %1949 = vmatprep.subr.bf16.mxu0 %v2095_v8 }
  0x2f   : > { %1950 = vmatpush3.bf16.msra.mxu0 %v2095_v8 }
  0x32   : > { %1952 = vmatmul.mubr.bf16.vlgmr.msra.gmra.mxu0 %v2097_v9 }
  0x33   : > { %1955 = vmatprep.mubr.bf16.mxu0 %v2098_v10 }
  0x3a   : > { %1956 = vmatmul.mubr.bf16.gmra.mxu0 %v2099_v11 }
  0x3b   : > { %1959 = vmatprep.mubr.bf16.mxu0 %v2100_v12 }
  0x42   : > { %1960 = vmatmul.mubr.bf16.gmra.mxu0 %v2101_v13 }
  0x43   : > { %1963 = vmatprep.mubr.bf16.mxu0 %v2102_v14 }
  0x4a   : > { %1964 = vmatmul.mubr.bf16.gmra.mxu0 %v2103_v15 }
  0xf2   : > { %v1953_v17 = vpop.f32.mrf.mxu0 }
  0xf4   : > { %v439_v18 = vpop.f32.mrf.mxu0 }
  0xf6   : > { %v1954_v19 = vpop.f32.mrf.mxu0 }
  0xf7   : > { %v1738_v20 = vpack.c.bf16 %v1954_v19, %v1953_v17 }
  0xf8   : > { %v442_v21 = vpop.f32.mrf.mxu0 }
  0xf9   : > { %1850 = vst [vmem:[#allocation2 + $0x8] sm:$0xff] %v1738_v20   ;;  %v1733_v22 = vpack.c.bf16 %v442_v21, %v439_v18 }
  0xfa   : > { %v1957_v23 = vpop.f32.mrf.mxu0 }
  0xfb   : > { %1734 = vst [vmem:[#allocation2] sm:$0xff] %v1733_v22  }
  0xfc   : > { %v455_v24 = vpop.f32.mrf.mxu0 }
  0xfe   : > { %v1958_v25 = vpop.f32.mrf.mxu0 }
  0xff   : > { %v1748_v26 = vpack.c.bf16 %v1958_v25, %v1957_v23 }
 0x100   : > { %v458_v27 = vpop.f32.mrf.mxu0  ;;  %v2110_v47 = vld [vmem:[#allocation2 + $0x8] sm:$0xff]  }
 0x101   : > { %1852 = vst [vmem:[#allocation2 + $0x18] sm:$0xff] %v1748_v26   ;;  %v1743_v28 = vpack.c.bf16 %v458_v27, %v455_v24 }
 0x102   : > { %v1961_v29 = vpop.f32.mrf.mxu0  ;;  %v2111_v48 = vld [vmem:[#allocation2] sm:$0xff]  }
 0x103   : > { %1851 = vst [vmem:[#allocation2 + $0x10] sm:$0xff] %v1743_v28  }
 0x104   : > { %v471_v30 = vpop.f32.mrf.mxu0 }
 0x106   : > { %v1962_v31 = vpop.f32.mrf.mxu0 }
 0x107   : > { %v1758_v32 = vpack.c.bf16 %v1962_v31, %v1961_v29 }
 0x108   : > { %v474_v33 = vpop.f32.mrf.mxu0  ;;  %v2108_v45 = vld [vmem:[#allocation2 + $0x18] sm:$0xff]  }
 0x109   : > { %1854 = vst [vmem:[#allocation2 + $0x28] sm:$0xff] %v1758_v32   ;;  %v1753_v34 = vpack.c.bf16 %v474_v33, %v471_v30 }
 0x10a   : > { %v1965_v35 = vpop.f32.mrf.mxu0  ;;  %v2109_v46 = vld [vmem:[#allocation2 + $0x10] sm:$0xff]  }
 0x10b   : > { %1853 = vst [vmem:[#allocation2 + $0x20] sm:$0xff] %v1753_v34  }
 0x10c   : > { %v487_v36 = vpop.f32.mrf.mxu0 }
 0x10e   : > { %v1966_v37 = vpop.f32.mrf.mxu0 }
 0x10f   : > { %v1768_v38 = vpack.c.bf16 %v1966_v37, %v1965_v35 }
 0x110   : > { %v490_v39 = vpop.f32.mrf.mxu0  ;;  %v2106_v43 = vld [vmem:[#allocation2 + $0x28] sm:$0xff]  }
 0x111   : > { %1856 = vst [vmem:[#allocation2 + $0x38] sm:$0xff] %v1768_v38   ;;  %v1763_v40 = vpack.c.bf16 %v490_v39, %v487_v36 }
 0x112   : > { %v2107_v44 = vld [vmem:[#allocation2 + $0x20] sm:$0xff]  }
 0x113   : > { %1855 = vst [vmem:[#allocation2 + $0x30] sm:$0xff] %v1763_v40  }
 0x118   : > { %v2104_v41 = vld [vmem:[#allocation2 + $0x38] sm:$0xff]  }
 0x119   : > { %1967 = vmatprep.subr.bf16.mxu1 %v2104_v41 }
 0x11a   : > { %v2105_v42 = vld [vmem:[#allocation2 + $0x30] sm:$0xff]   ;;  %1968 = vmatpush3.bf16.msra.mxu1 %v2104_v41 }
 0x11b   : > { %1969 = vmatprep.subr.bf16.mxu1 %v2105_v42 }
 0x11e   : > { %1970 = vmatpush3.bf16.msra.mxu1 %v2105_v42 }
 0x11f   : > { %1971 = vmatprep.subr.bf16.mxu1 %v2106_v43 }
 0x122   : > { %1972 = vmatpush3.bf16.msra.mxu1 %v2106_v43 }
 0x123   : > { %1973 = vmatprep.subr.bf16.mxu1 %v2107_v44 }
 0x126   : > { %1974 = vmatpush3.bf16.msra.mxu1 %v2107_v44 }
 0x127   : > { %1975 = vmatprep.subr.bf16.mxu1 %v2108_v45 }
 0x12a   : > { %1976 = vmatpush3.bf16.msra.mxu1 %v2108_v45 }
 0x12b   : > { %1977 = vmatprep.subr.bf16.mxu1 %v2109_v46 }
 0x12e   : > { %1978 = vmatpush3.bf16.msra.mxu1 %v2109_v46 }
 0x12f   : > { %1979 = vmatprep.subr.bf16.mxu1 %v2110_v47 }
 0x132   : > { %1980 = vmatpush3.bf16.msra.mxu1 %v2110_v47 }
 0x133   : > { %1981 = vmatprep.subr.bf16.mxu1 %v2111_v48 }
 0x136   : > { %1982 = vmatpush3.bf16.msra.mxu1 %v2111_v48 }
 0x139   : > { %1984 = vmatmul.mubr.bf16.vlgmr.msra.gmra.mxu1 %v2113_v49 }
 0x13a   : > { %1987 = vmatprep.mubr.bf16.mxu1 %v2114_v50 }
 0x141   : > { %1988 = vmatmul.mubr.bf16.gmra.mxu1 %v2115_v51 }
 0x142   : > { %1991 = vmatprep.mubr.bf16.mxu1 %v2116_v52 }
 0x149   : > { %1992 = vmatmul.mubr.bf16.gmra.mxu1 %v2117_v53 }
 0x14a   : > { %1995 = vmatprep.mubr.bf16.mxu1 %v2118_v54 }
 0x151   : > { %1996 = vmatmul.mubr.bf16.gmra.mxu1 %v2119_v55 }
 0x1f9   : > { %v1985_v57 = vpop.f32.mrf.mxu1 }
 0x1fa   : > { %v760_v60 = vadd.f32 %v1985_v57, %v1595_v58 }
 0x1fb   : > { %v751_v59 = vpop.f32.mrf.mxu1 }
 0x1fc   : > { %v752_v62 = vadd.f32 %v1595_v58, %v751_v59  ;;  %v816_v1 = vmax.f32 %v760_v60, 0.0 }
 0x1fd   : > { %v1986_v61 = vpop.f32.mrf.mxu1 }
 0x1fe   : > { %v763_v63 = vadd.f32 %v1986_v61, %v1595_v58  ;;  %v814_v5 = vmax.f32 %v752_v62, 0.0 }
 0x1ff   : > { %v754_v0 = vpop.f32.mrf.mxu1 }
 0x200   : > { %v817_v2 = vmax.f32 %v763_v63, 0.0  ;;  %v755_v3 = vadd.f32 %v1595_v58, %v754_v0 }
 0x201   : > { %v1989_v4 = vpop.f32.mrf.mxu1 }
 0x202   : > { %v1778_v6 = vpack.c.bf16 %v817_v2, %v816_v1  ;;  %v815_v7 = vmax.f32 %v755_v3, 0.0  ;;  %v776_v10 = vadd.f32 %v1989_v4, %v1595_v58 }
 0x203   : > { %v767_v8 = vpop.f32.mrf.mxu1 }
 0x204   : > { %1857 = vst [vmem:[#allocation3 + $0x8] sm:$0xff] %v1778_v6   ;;  %v1773_v9 = vpack.c.bf16 %v815_v7, %v814_v5  ;;  %v768_v12 = vadd.f32 %v1595_v58, %v767_v8  ;;  %v820_v15 = vmax.f32 %v776_v10, 0.0 }
 0x205   : > { %v1990_v11 = vpop.f32.mrf.mxu1 }
 0x206   : > { %1774 = vst [vmem:[#allocation3] sm:$0xff] %v1773_v9   ;;  %v779_v13 = vadd.f32 %v1990_v11, %v1595_v58  ;;  %v818_v19 = vmax.f32 %v768_v12, 0.0 }
 0x207   : > { %v770_v14 = vpop.f32.mrf.mxu1 }
 0x208   : > { %v821_v16 = vmax.f32 %v779_v13, 0.0  ;;  %v771_v17 = vadd.f32 %v1595_v58, %v770_v14 }
 0x209   : > { %v1993_v18 = vpop.f32.mrf.mxu1 }
 0x20a   : > { %v1788_v20 = vpack.c.bf16 %v821_v16, %v820_v15  ;;  %v819_v21 = vmax.f32 %v771_v17, 0.0  ;;  %v792_v24 = vadd.f32 %v1993_v18, %v1595_v58 }
 0x20b   : > { %v783_v22 = vpop.f32.mrf.mxu1 }
 0x20c   : > { %1859 = vst [vmem:[#allocation3 + $0x18] sm:$0xff] %v1788_v20   ;;  %v1783_v23 = vpack.c.bf16 %v819_v21, %v818_v19  ;;  %v784_v26 = vadd.f32 %v1595_v58, %v783_v22  ;;  %v824_v29 = vmax.f32 %v792_v24, 0.0 }
 0x20d   : > { %v1994_v25 = vpop.f32.mrf.mxu1 }
 0x20e   : > { %1858 = vst [vmem:[#allocation3 + $0x10] sm:$0xff] %v1783_v23   ;;  %v795_v27 = vadd.f32 %v1994_v25, %v1595_v58  ;;  %v822_v33 = vmax.f32 %v784_v26, 0.0 }
 0x20f   : > { %v786_v28 = vpop.f32.mrf.mxu1 }
 0x210   : > { %v825_v30 = vmax.f32 %v795_v27, 0.0  ;;  %v787_v31 = vadd.f32 %v1595_v58, %v786_v28 }
 0x211   : > { %v1997_v32 = vpop.f32.mrf.mxu1 }
 0x212   : > { %v1798_v34 = vpack.c.bf16 %v825_v30, %v824_v29  ;;  %v823_v35 = vmax.f32 %v787_v31, 0.0  ;;  %v808_v38 = vadd.f32 %v1997_v32, %v1595_v58 }
 0x213   : > { %v799_v36 = vpop.f32.mrf.mxu1 }
 0x214   : > { %1861 = vst [vmem:[#allocation3 + $0x28] sm:$0xff] %v1798_v34   ;;  %v1793_v37 = vpack.c.bf16 %v823_v35, %v822_v33  ;;  %v800_v40 = vadd.f32 %v1595_v58, %v799_v36  ;;  %v828_v43 = vmax.f32 %v808_v38, 0.0 }
 0x215   : > { %v1998_v39 = vpop.f32.mrf.mxu1 }
 0x216   : > { %1860 = vst [vmem:[#allocation3 + $0x20] sm:$0xff] %v1793_v37   ;;  %v811_v41 = vadd.f32 %v1998_v39, %v1595_v58  ;;  %v826_v46 = vmax.f32 %v800_v40, 0.0 }
 0x217   : > { %v802_v42 = vpop.f32.mrf.mxu1 }
 0x218   : > { %v829_v44 = vmax.f32 %v811_v41, 0.0  ;;  %v803_v45 = vadd.f32 %v1595_v58, %v802_v42 }
 0x21a   : > { %v1808_v47 = vpack.c.bf16 %v829_v44, %v828_v43  ;;  %v827_v48 = vmax.f32 %v803_v45, 0.0 }
 0x21c   : > { %1863 = vst [vmem:[#allocation3 + $0x38] sm:$0xff] %v1808_v47   ;;  %v1803_v49 = vpack.c.bf16 %v827_v48, %v826_v46 }
 0x21e   : > { %1862 = vst [vmem:[#allocation3 + $0x30] sm:$0xff] %v1803_v49  }
 0x21f PF: > { %p1628_p5 = scmp.ne.s32.totalorder %s2166_s21, 1 }
 0x221   : > { %933 = sbr.rel (%p1628_p5) target bundleno = 1072 (0x430), region = 56 }
 0x226   : > { %v2120_v50 = vld [vmem:[%s2469_s4 + $0x38] sm:$0xff]   ;;  %v2121_v51 = vld [vmem:[%s2469_s4 + $0x30] sm:$0xff]   ;;  %v2122_v52 = vld [vmem:[%s2469_s4 + $0x28] sm:$0xff]  }
 0x227   : > { %1999 = vmatprep.subr.bf16.mxu0 %v2120_v50  ;;  %v2123_v53 = vld [vmem:[%s2469_s4 + $0x20] sm:$0xff]   ;;  %v2124_v55 = vld [vmem:[%s2469_s4 + $0x18] sm:$0xff]   ;;  %v2125_v56 = vld [vmem:[%s2469_s4 + $0x10] sm:$0xff]  }
 0x228   : > { %2000 = vmatpush3.bf16.msra.mxu0 %v2120_v50  ;;  %v2128_v54 = vld [vmem:[#allocation3] sm:$0xff]   ;;  %v2126_v57 = vld [vmem:[%s2469_s4 + $0x8] sm:$0xff]   ;;  %v2130_v60 = vld [vmem:[#allocation3 + $0x10] sm:$0xff]  }
 0x229   : > { %2001 = vmatprep.subr.bf16.mxu0 %v2121_v51  ;;  %2015 = vmatprep.mubr.bf16.mxu0 %v2128_v54  ;;  %v2127_v58 = vld [vmem:[%s2469_s4] sm:$0xff]   ;;  %v2129_v59 = vld [vmem:[#allocation3 + $0x8] sm:$0xff]   ;;  %v2131_v61 = vld [vmem:[#allocation3 + $0x18] sm:$0xff]  }
 0x22a   : > { %v2132_v62 = vld [vmem:[#allocation3 + $0x20] sm:$0xff]   ;;  %v2133_v63 = vld [vmem:[#allocation3 + $0x28] sm:$0xff]   ;;  %v2134_v0 = vld [vmem:[#allocation3 + $0x30] sm:$0xff]  }
 0x22b   : > { %v2135_v1 = vld [vmem:[#allocation3 + $0x38] sm:$0xff]   ;;  %v2144_v2 = vld [vmem:[%s2465_s0] sm:$0xff]   ;;  %v2145_v35 = vld [vmem:[%s2465_s0 + $0x8] sm:$0xff]  }
 0x22c   : > { %2002 = vmatpush3.bf16.msra.mxu0 %v2121_v51  ;;  %2047 = vmatprep.mubr.bf16.mxu1 %v2144_v2  ;;  %v2146_v36 = vld [vmem:[%s2465_s0 + $0x10] sm:$0xff]   ;;  %v2147_v37 = vld [vmem:[%s2465_s0 + $0x18] sm:$0xff]   ;;  %v2148_v38 = vld [vmem:[%s2465_s0 + $0x20] sm:$0xff]  }
 0x22d   : > { %2003 = vmatprep.subr.bf16.mxu0 %v2122_v52  ;;  %v2149_v39 = vld [vmem:[%s2465_s0 + $0x28] sm:$0xff]   ;;  %v2150_v40 = vld [vmem:[%s2465_s0 + $0x30] sm:$0xff]   ;;  %v2151_v41 = vld [vmem:[%s2465_s0 + $0x38] sm:$0xff]  }
 0x22e   : > { %v1661_v42 = vld [vmem:[%s2470_s5] ss:$0 sm:$0xff] }
 0x230   : > { %2004 = vmatpush3.bf16.msra.mxu0 %v2122_v52 }
 0x231   : > { %2005 = vmatprep.subr.bf16.mxu0 %v2123_v53 }
 0x234   : > { %2006 = vmatpush3.bf16.msra.mxu0 %v2123_v53 }
 0x235   : > { %2007 = vmatprep.subr.bf16.mxu0 %v2124_v55 }
 0x238   : > { %2008 = vmatpush3.bf16.msra.mxu0 %v2124_v55 }
 0x239   : > { %2009 = vmatprep.subr.bf16.mxu0 %v2125_v56 }
 0x23c   : > { %2010 = vmatpush3.bf16.msra.mxu0 %v2125_v56 }
 0x23d   : > { %2011 = vmatprep.subr.bf16.mxu0 %v2126_v57 }
 0x240   : > { %2012 = vmatpush3.bf16.msra.mxu0 %v2126_v57 }
 0x241   : > { %2013 = vmatprep.subr.bf16.mxu0 %v2127_v58 }
 0x244   : > { %2014 = vmatpush3.bf16.msra.mxu0 %v2127_v58 }
 0x247   : > { %2016 = vmatmul.mubr.bf16.vlgmr.msra.gmra.mxu0 %v2129_v59 }
 0x248   : > { %2019 = vmatprep.mubr.bf16.mxu0 %v2130_v60 }
 0x24f   : > { %2020 = vmatmul.mubr.bf16.gmra.mxu0 %v2131_v61 }
 0x250   : > { %2023 = vmatprep.mubr.bf16.mxu0 %v2132_v62 }
 0x257   : > { %2024 = vmatmul.mubr.bf16.gmra.mxu0 %v2133_v63 }
 0x258   : > { %2027 = vmatprep.mubr.bf16.mxu0 %v2134_v0 }
 0x25f   : > { %2028 = vmatmul.mubr.bf16.gmra.mxu0 %v2135_v1 }
 0x307   : > { %v2017_v3 = vpop.f32.mrf.mxu0 }
 0x309   : > { %v1100_v4 = vpop.f32.mrf.mxu0 }
 0x30b   : > { %v2018_v5 = vpop.f32.mrf.mxu0 }
 0x30c   : > { %v1818_v6 = vpack.c.bf16 %v2018_v5, %v2017_v3 }
 0x30d   : > { %v1103_v7 = vpop.f32.mrf.mxu0 }
 0x30e   : > { %1864 = vst [vmem:[#allocation4 + $0x8] sm:$0xff] %v1818_v6   ;;  %v1813_v8 = vpack.c.bf16 %v1103_v7, %v1100_v4 }
 0x30f   : > { %v2021_v9 = vpop.f32.mrf.mxu0 }
 0x310   : > { %1814 = vst [vmem:[#allocation4] sm:$0xff] %v1813_v8  }
 0x311   : > { %v1116_v10 = vpop.f32.mrf.mxu0 }
 0x313   : > { %v2022_v11 = vpop.f32.mrf.mxu0 }
 0x314   : > { %v1828_v12 = vpack.c.bf16 %v2022_v11, %v2021_v9 }
 0x315   : > { %v1119_v13 = vpop.f32.mrf.mxu0  ;;  %v2142_v33 = vld [vmem:[#allocation4 + $0x8] sm:$0xff]  }
 0x316   : > { %1866 = vst [vmem:[#allocation4 + $0x18] sm:$0xff] %v1828_v12   ;;  %v1823_v14 = vpack.c.bf16 %v1119_v13, %v1116_v10 }
 0x317   : > { %v2025_v15 = vpop.f32.mrf.mxu0  ;;  %v2143_v34 = vld [vmem:[#allocation4] sm:$0xff]  }
 0x318   : > { %1865 = vst [vmem:[#allocation4 + $0x10] sm:$0xff] %v1823_v14  }
 0x319   : > { %v1132_v16 = vpop.f32.mrf.mxu0 }
 0x31b   : > { %v2026_v17 = vpop.f32.mrf.mxu0 }
 0x31c   : > { %v1838_v18 = vpack.c.bf16 %v2026_v17, %v2025_v15 }
 0x31d   : > { %v1135_v19 = vpop.f32.mrf.mxu0  ;;  %v2140_v31 = vld [vmem:[#allocation4 + $0x18] sm:$0xff]  }
 0x31e   : > { %1868 = vst [vmem:[#allocation4 + $0x28] sm:$0xff] %v1838_v18   ;;  %v1833_v20 = vpack.c.bf16 %v1135_v19, %v1132_v16 }
 0x31f   : > { %v2029_v21 = vpop.f32.mrf.mxu0  ;;  %v2141_v32 = vld [vmem:[#allocation4 + $0x10] sm:$0xff]  }
 0x320   : > { %1867 = vst [vmem:[#allocation4 + $0x20] sm:$0xff] %v1833_v20  }
 0x321   : > { %v1148_v22 = vpop.f32.mrf.mxu0 }
 0x323   : > { %v2030_v23 = vpop.f32.mrf.mxu0 }
 0x324   : > { %v1848_v24 = vpack.c.bf16 %v2030_v23, %v2029_v21 }
 0x325   : > { %v1151_v25 = vpop.f32.mrf.mxu0  ;;  %v2138_v29 = vld [vmem:[#allocation4 + $0x28] sm:$0xff]  }
 0x326   : > { %1870 = vst [vmem:[#allocation4 + $0x38] sm:$0xff] %v1848_v24   ;;  %v1843_v26 = vpack.c.bf16 %v1151_v25, %v1148_v22 }
 0x327   : > { %v2139_v30 = vld [vmem:[#allocation4 + $0x20] sm:$0xff]  }
 0x328   : > { %1869 = vst [vmem:[#allocation4 + $0x30] sm:$0xff] %v1843_v26  }
 0x32d   : > { %v2136_v27 = vld [vmem:[#allocation4 + $0x38] sm:$0xff]  }
 0x32e   : > { %2031 = vmatprep.subr.bf16.mxu1 %v2136_v27 }
 0x32f   : > { %v2137_v28 = vld [vmem:[#allocation4 + $0x30] sm:$0xff]   ;;  %2032 = vmatpush3.bf16.msra.mxu1 %v2136_v27 }
 0x330   : > { %2033 = vmatprep.subr.bf16.mxu1 %v2137_v28 }
 0x333   : > { %2034 = vmatpush3.bf16.msra.mxu1 %v2137_v28 }
 0x334   : > { %2035 = vmatprep.subr.bf16.mxu1 %v2138_v29 }
 0x337   : > { %2036 = vmatpush3.bf16.msra.mxu1 %v2138_v29 }
 0x338   : > { %2037 = vmatprep.subr.bf16.mxu1 %v2139_v30 }
 0x33b   : > { %2038 = vmatpush3.bf16.msra.mxu1 %v2139_v30 }
 0x33c   : > { %2039 = vmatprep.subr.bf16.mxu1 %v2140_v31 }
 0x33f   : > { %2040 = vmatpush3.bf16.msra.mxu1 %v2140_v31 }
 0x340   : > { %2041 = vmatprep.subr.bf16.mxu1 %v2141_v32 }
 0x343   : > { %2042 = vmatpush3.bf16.msra.mxu1 %v2141_v32 }
 0x344   : > { %2043 = vmatprep.subr.bf16.mxu1 %v2142_v33 }
 0x347   : > { %2044 = vmatpush3.bf16.msra.mxu1 %v2142_v33 }
 0x348   : > { %2045 = vmatprep.subr.bf16.mxu1 %v2143_v34 }
 0x34b   : > { %2046 = vmatpush3.bf16.msra.mxu1 %v2143_v34 }
 0x34e   : > { %2048 = vmatmul.mubr.bf16.vlgmr.msra.gmra.mxu1 %v2145_v35 }
 0x34f   : > { %2051 = vmatprep.mubr.bf16.mxu1 %v2146_v36 }
 0x356   : > { %2052 = vmatmul.mubr.bf16.gmra.mxu1 %v2147_v37 }
 0x357   : > { %2055 = vmatprep.mubr.bf16.mxu1 %v2148_v38 }
 0x35e   : > { %2056 = vmatmul.mubr.bf16.gmra.mxu1 %v2149_v39 }
 0x35f   : > { %2059 = vmatprep.mubr.bf16.mxu1 %v2150_v40 }
 0x366   : > { %2060 = vmatmul.mubr.bf16.gmra.mxu1 %v2151_v41 }
 0x40e   : > { %v2049_v43 = vpop.f32.mrf.mxu1 }
 0x40f   : > { %v1421_v44 = vadd.f32 %v2049_v43, %v1661_v42 }
 0x410   : > { %v1412_v45 = vpop.f32.mrf.mxu1 }
 0x411   : > { %1477 = vst [vmem:[%s2471_s6 + $0x10] sm:$0xff] %v1421_v44  ;;  %v1413_v46 = vadd.f32 %v1661_v42, %v1412_v45 }
 0x412   : > { %v2050_v47 = vpop.f32.mrf.mxu1 }
 0x413   : > { %1475 = vst [vmem:[%s2471_s6] sm:$0xff] %v1413_v46  ;;  %v1424_v48 = vadd.f32 %v2050_v47, %v1661_v42 }
 0x414   : > { %v1415_v49 = vpop.f32.mrf.mxu1 }
 0x415   : > { %1478 = vst [vmem:[%s2471_s6 + $0x18] sm:$0xff] %v1424_v48  ;;  %v1416_v50 = vadd.f32 %v1661_v42, %v1415_v49 }
 0x416   : > { %v2053_v51 = vpop.f32.mrf.mxu1 }
 0x417   : > { %1476 = vst [vmem:[%s2471_s6 + $0x8] sm:$0xff] %v1416_v50  ;;  %v1437_v52 = vadd.f32 %v2053_v51, %v1661_v42 }
 0x418   : > { %v1428_v53 = vpop.f32.mrf.mxu1 }
 0x419   : > { %1481 = vst [vmem:[%s2471_s6 + $0x30] sm:$0xff] %v1437_v52  ;;  %v1429_v54 = vadd.f32 %v1661_v42, %v1428_v53 }
 0x41a   : > { %v2054_v55 = vpop.f32.mrf.mxu1 }
 0x41b   : > { %1479 = vst [vmem:[%s2471_s6 + $0x20] sm:$0xff] %v1429_v54  ;;  %v1440_v56 = vadd.f32 %v2054_v55, %v1661_v42 }
 0x41c   : > { %v1431_v57 = vpop.f32.mrf.mxu1 }
 0x41d   : > { %1482 = vst [vmem:[%s2471_s6 + $0x38] sm:$0xff] %v1440_v56  ;;  %v1432_v58 = vadd.f32 %v1661_v42, %v1431_v57 }
 0x41e   : > { %v2057_v59 = vpop.f32.mrf.mxu1 }
 0x41f   : > { %1480 = vst [vmem:[%s2471_s6 + $0x28] sm:$0xff] %v1432_v58  ;;  %v1453_v60 = vadd.f32 %v2057_v59, %v1661_v42 }
 0x420   : > { %v1444_v61 = vpop.f32.mrf.mxu1 }
 0x421   : > { %1485 = vst [vmem:[%s2471_s6 + $0x50] sm:$0xff] %v1453_v60  ;;  %v1445_v62 = vadd.f32 %v1661_v42, %v1444_v61 }
 0x422   : > { %v2058_v63 = vpop.f32.mrf.mxu1 }
 0x423   : > { %1483 = vst [vmem:[%s2471_s6 + $0x40] sm:$0xff] %v1445_v62  ;;  %v1456_v0 = vadd.f32 %v2058_v63, %v1661_v42 }
 0x424   : > { %v1447_v1 = vpop.f32.mrf.mxu1 }
 0x425   : > { %1486 = vst [vmem:[%s2471_s6 + $0x58] sm:$0xff] %v1456_v0  ;;  %v1448_v2 = vadd.f32 %v1661_v42, %v1447_v1 }
 0x426   : > { %v2061_v3 = vpop.f32.mrf.mxu1 }
 0x427   : > { %1484 = vst [vmem:[%s2471_s6 + $0x48] sm:$0xff] %v1448_v2  ;;  %v1469_v4 = vadd.f32 %v2061_v3, %v1661_v42 }
 0x428   : > { %v1460_v5 = vpop.f32.mrf.mxu1 }
 0x429   : > { %1489 = vst [vmem:[%s2471_s6 + $0x70] sm:$0xff] %v1469_v4  ;;  %v1461_v6 = vadd.f32 %v1661_v42, %v1460_v5 }
 0x42a   : > { %v2062_v7 = vpop.f32.mrf.mxu1 }
 0x42b   : > { %1487 = vst [vmem:[%s2471_s6 + $0x60] sm:$0xff] %v1461_v6  ;;  %v1472_v8 = vadd.f32 %v2062_v7, %v1661_v42 }
 0x42c   : > { %v1463_v9 = vpop.f32.mrf.mxu1 }
 0x42d   : > { %1490 = vst [vmem:[%s2471_s6 + $0x78] sm:$0xff] %v1472_v8  ;;  %v1464_v10 = vadd.f32 %v1661_v42, %v1463_v9 }
 0x42f   : > { %1488 = vst [vmem:[%s2471_s6 + $0x68] sm:$0xff] %v1464_v10 }
 0x430 PF: > { %s16_s23 = sadd.s32 1, %s2174_s23   ;;  %s2472_s21 = smov %s2170_s22 }
 0x431   : > { %p13_p6 = scmp.ge.s32.totalorder %s16_s23, 4   ;;  %s2473_s22 = smov %s2475_s24 }
 0x433   :  { %15 = sbr.rel (!%p13_p6) target bundleno = 2 (0x2), region = 91 }

</bundles_post_ra>
